<compile_context>
chip_gen: v7x
topology: tpu7x:2x2x1
jax: 0.10.0
libtpu: 0.0.40
codegen_flags: <defaults>
</compile_context>

<pallas_src>
import jax
import jax.numpy as jnp
from jax.experimental import pallas as pl
from jax.experimental.pallas import tpu as pltpu


def _result_map_kernel(x_ref, w_ref, b_ref, o_ref):
    # x_ref: (1, C_in, sb, 128)  VMEM
    # w_ref: (C_out, C_in)       SMEM (scalars, resident across the grid)
    # b_ref: (C_out,)            SMEM
    # o_ref: (1, C_out, sb, 128) VMEM
    c_in = x_ref.shape[1]
    c_out = o_ref.shape[1]

    # Hoisted channel loads: each input slab is read from VMEM exactly once.
    xs = [x_ref[0, ci].astype(jnp.float32) for ci in range(c_in)]

    # Fully unrolled (tiny, static channel counts): pure VPU FMAs on dense
    # (sb, 128) tiles -- no MXU, no masked sub-128-lane stores.
    for co in range(c_out):
        acc = xs[0] * w_ref[co, 0]
        for ci in range(1, c_in):
            acc = acc + xs[ci] * w_ref[co, ci]
        acc = acc + b_ref[co]
        # sigmoid(z) == 0.5 * (tanh(0.5*z) + 1): one EUP op per element.
        o_ref[0, co] = (0.5 * (jnp.tanh(0.5 * acc) + 1.0)).astype(o_ref.dtype)


def _pick_row_tile(n, r, max_rows=512, min_steps=4):
    """Rows-of-128-lanes per block.

    Starts at full extent (always legal) capped at max_rows (multiple of 8),
    then shrinks (staying a multiple of 8) until the grid has at least
    `min_steps` steps so a 2-TC chip (v7x) can shard the parallel grid and
    the input/output pipeline actually overlaps.
    """
    sb = r if r <= max_rows else max_rows
    while n * pl.cdiv(r, sb) < min_steps and sb > 8:
        new_sb = max(8, ((sb // 2) + 7) // 8 * 8)
        if new_sb >= sb:
            break
        sb = new_sb
    return sb


def result_map_forward(x_nchw, weight, bias, *, max_rows=512):
    """1x1 Conv2d + Sigmoid, matching nn.Conv2d(in_ch, out_ch, 1) -> Sigmoid.

    x_nchw : (N, C_in, H, W)
    weight : (C_out, C_in, 1, 1)   (PyTorch conv weight layout)
    bias   : (C_out,)
    returns: (N, C_out, H, W)
    """
    N, C_in, H, W = x_nchw.shape
    C_out = weight.shape[0]
    HW = H * W

    # Pad the spatial extent up to a multiple of 128 so the lane axis is
    # always 128-dense (no single-sublane-row fallback).  Padding is a few %
    # of HBM traffic at worst and is cropped after the kernel.
    LW = 128
    R = pl.cdiv(HW, LW)
    HWp = R * LW
    x3 = x_nchw.reshape(N, C_in, HW)
    if HWp != HW:
        x3 = jnp.pad(x3, ((0, 0), (0, 0), (0, HWp - HW)))
    x4 = x3.reshape(N, C_in, R, LW)

    w2 = weight.reshape(C_out, C_in).astype(jnp.float32)
    b1 = bias.reshape(C_out).astype(jnp.float32)

    sb = _pick_row_tile(N, R, max_rows=max_rows)
    grid = (N, pl.cdiv(R, sb))

    out4 = pl.pallas_call(
        _result_map_kernel,
        out_shape=jax.ShapeDtypeStruct((N, C_out, R, LW), x_nchw.dtype),
        grid_spec=pltpu.PrefetchScalarGridSpec(
            num_scalar_prefetch=0,
            grid=grid,
            in_specs=[
                pl.BlockSpec((1, C_in, sb, LW), lambda n, s: (n, 0, s, 0)),
                pl.BlockSpec(memory_space=pltpu.MemorySpace.SMEM),  # weights
                pl.BlockSpec(memory_space=pltpu.MemorySpace.SMEM),  # bias
            ],
            out_specs=pl.BlockSpec((1, C_out, sb, LW),
                                   lambda n, s: (n, 0, s, 0)),
        ),
        compiler_params=pltpu.CompilerParams(
            dimension_semantics=("parallel", "parallel")),
    )(x4, w2, b1)

    # Crop padding (if any) and reshape back to NCHW -- both free / cheap.
    out3 = out4.reshape(N, C_out, HWp)
    if HWp != HW:
        out3 = out3[:, :, :HW]
    return out3.reshape(N, C_out, H, W)


if __name__ == "__main__":
    # Deterministic parameter init mimicking nn.Conv2d default
    # (uniform in [-1/sqrt(fan_in), 1/sqrt(fan_in)], fan_in = in_ch * 1 * 1).
    key = jax.random.PRNGKey(0)
    N, in_ch, out_ch, Hh, Ww = 2, 4, 3, 16, 16

    k_x, k_w, k_b = jax.random.split(key, 3)
    bound = 1.0 / jnp.sqrt(jnp.float32(in_ch))
    weight = jax.random.uniform(k_w, (out_ch, in_ch, 1, 1),
                                minval=-bound, maxval=bound,
                                dtype=jnp.float32)
    bias = jax.random.uniform(k_b, (out_ch,),
                              minval=-bound, maxval=bound,
                              dtype=jnp.float32)
    x = jax.random.normal(k_x, (N, in_ch, Hh, Ww), dtype=jnp.float32)

    out = result_map_forward(x, weight, bias)
    jax.block_until_ready(out)

    # Cross-check against a pure-JAX reference of the same math.
    ref = jax.nn.sigmoid(
        jnp.einsum("nchw,oc->nohw", x, weight.reshape(out_ch, in_ch))
        + bias[None, :, None, None]
    )
    assert out.shape == (N, out_ch, Hh, Ww)
    assert jnp.allclose(out, ref, atol=3e-5, rtol=1e-5)

    print("KERNEL_OK")
</pallas_src>

<mosaic_0001>
module attributes {stable_mosaic.version = 11 : i64} {
  func.func @_result_map_kernel(%arg0: i32, %arg1: i32, %arg2: memref<1x4x2x128xf32, #tpu.memory_space<vmem>>, %arg3: memref<3x4xf32, #tpu.memory_space<smem>>, %arg4: memref<3xf32, #tpu.memory_space<smem>>, %arg5: memref<1x3x2x128xf32, #tpu.memory_space<vmem>>) attributes {dimension_semantics = [#tpu.dimension_semantics<parallel>, #tpu.dimension_semantics<parallel>], iteration_bounds = array<i64: 2, 1>, scalar_prefetch = 0 : i64, scratch_operands = 0 : i64, tpu.core_type = #tpu.core_type<tc>, window_params = [{transform_indices = @transform_0, window_bounds = array<i64: 1, 4, 2, 128>}, {transform_indices = @transform_1, window_bounds = array<i64: 3, 4>}, {transform_indices = @transform_2, window_bounds = array<i64: 3>}, {transform_indices = @transform_3, window_bounds = array<i64: 1, 3, 2, 128>}]} {
    %c0 = arith.constant 0 : index
    %c0_0 = arith.constant 0 : index
    %c0_1 = arith.constant 0 : index
    %c0_2 = arith.constant 0 : index
    %0 = vector.load %arg2[%c0, %c0_0, %c0_1, %c0_2] : memref<1x4x2x128xf32, #tpu.memory_space<vmem>>, vector<1x1x2x128xf32>
    %1 = vector.shape_cast %0 : vector<1x1x2x128xf32> to vector<2x128xf32>
    %c0_3 = arith.constant 0 : index
    %c1 = arith.constant 1 : index
    %c0_4 = arith.constant 0 : index
    %c0_5 = arith.constant 0 : index
    %2 = vector.load %arg2[%c0_3, %c1, %c0_4, %c0_5] : memref<1x4x2x128xf32, #tpu.memory_space<vmem>>, vector<1x1x2x128xf32>
    %3 = vector.shape_cast %2 : vector<1x1x2x128xf32> to vector<2x128xf32>
    %c0_6 = arith.constant 0 : index
    %c2 = arith.constant 2 : index
    %c0_7 = arith.constant 0 : index
    %c0_8 = arith.constant 0 : index
    %4 = vector.load %arg2[%c0_6, %c2, %c0_7, %c0_8] : memref<1x4x2x128xf32, #tpu.memory_space<vmem>>, vector<1x1x2x128xf32>
    %5 = vector.shape_cast %4 : vector<1x1x2x128xf32> to vector<2x128xf32>
    %c0_9 = arith.constant 0 : index
    %c3 = arith.constant 3 : index
    %c0_10 = arith.constant 0 : index
    %c0_11 = arith.constant 0 : index
    %6 = vector.load %arg2[%c0_9, %c3, %c0_10, %c0_11] : memref<1x4x2x128xf32, #tpu.memory_space<vmem>>, vector<1x1x2x128xf32>
    %7 = vector.shape_cast %6 : vector<1x1x2x128xf32> to vector<2x128xf32>
    %c0_12 = arith.constant 0 : index
    %c0_13 = arith.constant 0 : index
    %8 = memref.load %arg3[%c0_12, %c0_13] : memref<3x4xf32, #tpu.memory_space<smem>>
    %9 = vector.broadcast %8 : f32 to vector<2x128xf32>
    %10 = arith.mulf %1, %9 : vector<2x128xf32>
    %c0_14 = arith.constant 0 : index
    %c1_15 = arith.constant 1 : index
    %11 = memref.load %arg3[%c0_14, %c1_15] : memref<3x4xf32, #tpu.memory_space<smem>>
    %12 = vector.broadcast %11 : f32 to vector<2x128xf32>
    %13 = arith.mulf %3, %12 : vector<2x128xf32>
    %14 = arith.addf %10, %13 : vector<2x128xf32>
    %c0_16 = arith.constant 0 : index
    %c2_17 = arith.constant 2 : index
    %15 = memref.load %arg3[%c0_16, %c2_17] : memref<3x4xf32, #tpu.memory_space<smem>>
    %16 = vector.broadcast %15 : f32 to vector<2x128xf32>
    %17 = arith.mulf %5, %16 : vector<2x128xf32>
    %18 = arith.addf %14, %17 : vector<2x128xf32>
    %c0_18 = arith.constant 0 : index
    %c3_19 = arith.constant 3 : index
    %19 = memref.load %arg3[%c0_18, %c3_19] : memref<3x4xf32, #tpu.memory_space<smem>>
    %20 = vector.broadcast %19 : f32 to vector<2x128xf32>
    %21 = arith.mulf %7, %20 : vector<2x128xf32>
    %22 = arith.addf %18, %21 : vector<2x128xf32>
    %c0_20 = arith.constant 0 : index
    %23 = memref.load %arg4[%c0_20] : memref<3xf32, #tpu.memory_space<smem>>
    %24 = vector.broadcast %23 : f32 to vector<2x128xf32>
    %25 = arith.addf %22, %24 : vector<2x128xf32>
    %cst = arith.constant 5.000000e-01 : f32
    %26 = vector.broadcast %cst : f32 to vector<2x128xf32>
    %27 = arith.mulf %26, %25 : vector<2x128xf32>
    %28 = math.tanh %27 : vector<2x128xf32>
    %cst_21 = arith.constant 1.000000e+00 : f32
    %29 = vector.broadcast %cst_21 : f32 to vector<2x128xf32>
    %30 = arith.addf %28, %29 : vector<2x128xf32>
    %cst_22 = arith.constant 5.000000e-01 : f32
    %31 = vector.broadcast %cst_22 : f32 to vector<2x128xf32>
    %32 = arith.mulf %31, %30 : vector<2x128xf32>
    %c0_23 = arith.constant 0 : index
    %c0_24 = arith.constant 0 : index
    %c0_25 = arith.constant 0 : index
    %c0_26 = arith.constant 0 : index
    %33 = vector.load %arg5[%c0_23, %c0_24, %c0_25, %c0_26] : memref<1x3x2x128xf32, #tpu.memory_space<vmem>>, vector<1x1x2x128xf32>
    %34 = vector.shape_cast %33 : vector<1x1x2x128xf32> to vector<2x128xf32>
    %35 = vector.shape_cast %32 : vector<2x128xf32> to vector<1x1x2x128xf32>
    tpu.vector_store %arg5[%c0_23, %c0_24, %c0_25, %c0_26], %35 {strides = array<i32>} : memref<1x3x2x128xf32, #tpu.memory_space<vmem>>, vector<1x1x2x128xf32>,
    %c1_27 = arith.constant 1 : index
    %c0_28 = arith.constant 0 : index
    %36 = memref.load %arg3[%c1_27, %c0_28] : memref<3x4xf32, #tpu.memory_space<smem>>
    %37 = vector.broadcast %36 : f32 to vector<2x128xf32>
    %38 = arith.mulf %1, %37 : vector<2x128xf32>
    %c1_29 = arith.constant 1 : index
    %c1_30 = arith.constant 1 : index
    %39 = memref.load %arg3[%c1_29, %c1_30] : memref<3x4xf32, #tpu.memory_space<smem>>
    %40 = vector.broadcast %39 : f32 to vector<2x128xf32>
    %41 = arith.mulf %3, %40 : vector<2x128xf32>
    %42 = arith.addf %38, %41 : vector<2x128xf32>
    %c1_31 = arith.constant 1 : index
    %c2_32 = arith.constant 2 : index
    %43 = memref.load %arg3[%c1_31, %c2_32] : memref<3x4xf32, #tpu.memory_space<smem>>
    %44 = vector.broadcast %43 : f32 to vector<2x128xf32>
    %45 = arith.mulf %5, %44 : vector<2x128xf32>
    %46 = arith.addf %42, %45 : vector<2x128xf32>
    %c1_33 = arith.constant 1 : index
    %c3_34 = arith.constant 3 : index
    %47 = memref.load %arg3[%c1_33, %c3_34] : memref<3x4xf32, #tpu.memory_space<smem>>
    %48 = vector.broadcast %47 : f32 to vector<2x128xf32>
    %49 = arith.mulf %7, %48 : vector<2x128xf32>
    %50 = arith.addf %46, %49 : vector<2x128xf32>
    %c1_35 = arith.constant 1 : index
    %51 = memref.load %arg4[%c1_35] : memref<3xf32, #tpu.memory_space<smem>>
    %52 = vector.broadcast %51 : f32 to vector<2x128xf32>
    %53 = arith.addf %50, %52 : vector<2x128xf32>
    %cst_36 = arith.constant 5.000000e-01 : f32
    %54 = vector.broadcast %cst_36 : f32 to vector<2x128xf32>
    %55 = arith.mulf %54, %53 : vector<2x128xf32>
    %56 = math.tanh %55 : vector<2x128xf32>
    %cst_37 = arith.constant 1.000000e+00 : f32
    %57 = vector.broadcast %cst_37 : f32 to vector<2x128xf32>
    %58 = arith.addf %56, %57 : vector<2x128xf32>
    %cst_38 = arith.constant 5.000000e-01 : f32
    %59 = vector.broadcast %cst_38 : f32 to vector<2x128xf32>
    %60 = arith.mulf %59, %58 : vector<2x128xf32>
    %c0_39 = arith.constant 0 : index
    %c1_40 = arith.constant 1 : index
    %c0_41 = arith.constant 0 : index
    %c0_42 = arith.constant 0 : index
    %61 = vector.load %arg5[%c0_39, %c1_40, %c0_41, %c0_42] : memref<1x3x2x128xf32, #tpu.memory_space<vmem>>, vector<1x1x2x128xf32>
    %62 = vector.shape_cast %61 : vector<1x1x2x128xf32> to vector<2x128xf32>
    %63 = vector.shape_cast %60 : vector<2x128xf32> to vector<1x1x2x128xf32>
    tpu.vector_store %arg5[%c0_39, %c1_40, %c0_41, %c0_42], %63 {strides = array<i32>} : memref<1x3x2x128xf32, #tpu.memory_space<vmem>>, vector<1x1x2x128xf32>,
    %c2_43 = arith.constant 2 : index
    %c0_44 = arith.constant 0 : index
    %64 = memref.load %arg3[%c2_43, %c0_44] : memref<3x4xf32, #tpu.memory_space<smem>>
    %65 = vector.broadcast %64 : f32 to vector<2x128xf32>
    %66 = arith.mulf %1, %65 : vector<2x128xf32>
    %c2_45 = arith.constant 2 : index
    %c1_46 = arith.constant 1 : index
    %67 = memref.load %arg3[%c2_45, %c1_46] : memref<3x4xf32, #tpu.memory_space<smem>>
    %68 = vector.broadcast %67 : f32 to vector<2x128xf32>
    %69 = arith.mulf %3, %68 : vector<2x128xf32>
    %70 = arith.addf %66, %69 : vector<2x128xf32>
    %c2_47 = arith.constant 2 : index
    %c2_48 = arith.constant 2 : index
    %71 = memref.load %arg3[%c2_47, %c2_48] : memref<3x4xf32, #tpu.memory_space<smem>>
    %72 = vector.broadcast %71 : f32 to vector<2x128xf32>
    %73 = arith.mulf %5, %72 : vector<2x128xf32>
    %74 = arith.addf %70, %73 : vector<2x128xf32>
    %c2_49 = arith.constant 2 : index
    %c3_50 = arith.constant 3 : index
    %75 = memref.load %arg3[%c2_49, %c3_50] : memref<3x4xf32, #tpu.memory_space<smem>>
    %76 = vector.broadcast %75 : f32 to vector<2x128xf32>
    %77 = arith.mulf %7, %76 : vector<2x128xf32>
    %78 = arith.addf %74, %77 : vector<2x128xf32>
    %c2_51 = arith.constant 2 : index
    %79 = memref.load %arg4[%c2_51] : memref<3xf32, #tpu.memory_space<smem>>
    %80 = vector.broadcast %79 : f32 to vector<2x128xf32>
    %81 = arith.addf %78, %80 : vector<2x128xf32>
    %cst_52 = arith.constant 5.000000e-01 : f32
    %82 = vector.broadcast %cst_52 : f32 to vector<2x128xf32>
    %83 = arith.mulf %82, %81 : vector<2x128xf32>
    %84 = math.tanh %83 : vector<2x128xf32>
    %cst_53 = arith.constant 1.000000e+00 : f32
    %85 = vector.broadcast %cst_53 : f32 to vector<2x128xf32>
    %86 = arith.addf %84, %85 : vector<2x128xf32>
    %cst_54 = arith.constant 5.000000e-01 : f32
    %87 = vector.broadcast %cst_54 : f32 to vector<2x128xf32>
    %88 = arith.mulf %87, %86 : vector<2x128xf32>
    %c0_55 = arith.constant 0 : index
    %c2_56 = arith.constant 2 : index
    %c0_57 = arith.constant 0 : index
    %c0_58 = arith.constant 0 : index
    %89 = vector.load %arg5[%c0_55, %c2_56, %c0_57, %c0_58] : memref<1x3x2x128xf32, #tpu.memory_space<vmem>>, vector<1x1x2x128xf32>
    %90 = vector.shape_cast %89 : vector<1x1x2x128xf32> to vector<2x128xf32>
    %91 = vector.shape_cast %88 : vector<2x128xf32> to vector<1x1x2x128xf32>
    tpu.vector_store %arg5[%c0_55, %c2_56, %c0_57, %c0_58], %91 {strides = array<i32>} : memref<1x3x2x128xf32, #tpu.memory_space<vmem>>, vector<1x1x2x128xf32>,
    return
  }
  func.func @transform_0(%arg0: i32, %arg1: i32) -> (i32, i32, i32, i32) {
    %c0_i32 = arith.constant 0 : i32
    %c0_i32_0 = arith.constant 0 : i32
    %c0_i32_1 = arith.constant 0 : i32
    return %arg0, %c0_i32, %arg1, %c0_i32_0 : i32, i32, i32, i32
  }
  func.func @transform_1(%arg0: i32, %arg1: i32) -> (i32, i32) {
    %c0_i32 = arith.constant 0 : i32
    %c0_i32_0 = arith.constant 0 : i32
    %c0_i32_1 = arith.constant 0 : i32
    return %c0_i32, %c0_i32_0 : i32, i32
  }
  func.func @transform_2(%arg0: i32, %arg1: i32) -> i32 {
    %c0_i32 = arith.constant 0 : i32
    %c0_i32_0 = arith.constant 0 : i32
    return %c0_i32 : i32
  }
  func.func @transform_3(%arg0: i32, %arg1: i32) -> (i32, i32, i32, i32) {
    %c0_i32 = arith.constant 0 : i32
    %c0_i32_0 = arith.constant 0 : i32
    %c0_i32_1 = arith.constant 0 : i32
    return %arg0, %c0_i32, %arg1, %c0_i32_0 : i32, i32, i32, i32
  }
}

</mosaic_0001>

<bundles_post_ra>
// kernel: tpu_custom_call.1
= control target key start
LH: loop header
LB: loop body
LE: loop exit
PB: predicated region body
PF: predicated region fallthrough
CT: control target
= control target key end

     0   :  { %8 = vsyncpa [#allocation3], 0  ;;  %s970_s0 = inlined_call_operand.hbm [shape: f32[2,4,2,128], index: 0, kind: input, shape index: {}]   ;;  %s971_s1 = inlined_call_operand.hbm [shape: f32[3,4], index: 1, kind: input, shape index: {}]   ;;  %s972_s2 = inlined_call_operand.vmem [shape: f32[3], index: 2, kind: input, shape index: {}]   ;;  %s973_s3 = inlined_call_operand.hbm [shape: f32[2,3,2,128], index: 3, kind: output, shape index: {}]  }
   0x1   :  { %10 = vsyncpa [#allocation3 + $0x1], 0 }
   0x2   :  { %11 = vsyncpa [#allocation5], 0 }
   0x3   :  { %12 = vsyncpa [#allocation6], 0 }
   0x4   :  { %13 = vsyncpa [#allocation4], 0 }
   0x5   :  { %15 = vsyncpa [#allocation4 + $0x1], 0  ;;  %s741_s12 = smov 0   ;;  %s743_s13 = smov 0  }
   0x6   :  { %s745_s14 = smov 0   ;;  %s747_s15 = smov 0  }
   0x7   :  { %s749_s16 = smov 0   ;;  %s751_s17 = smov 0  }
   0x8 LB: > { %s433_s18 = sadd.s32 4294967295, %s711_s17   ;;  %s434_s19 = sadd.s32 4294967294, %s711_s17   ;;  %s711_s17 = sphi %s751_s17, %s21_s17   ;;  %s707_s16 = sphi %s749_s16, %s994_s16   ;;  %s703_s15 = sphi %s747_s15, %s993_s15   ;;  %s699_s14 = sphi %s745_s14, %s992_s14   ;;  %s695_s13 = sphi %s743_s13, %s991_s13   ;;  %s691_s12 = sphi %s741_s12, %s990_s12  }
   0x9   : > { %s42_s20 = sadd.s32 1, %s699_s14  ;;  %p49_p0 = scmp.ne.s32.totalorder %s699_s14, %s695_s13 }
   0xa   : > { %p50_p1 = scmp.eq.s32.totalorder %s711_s17, 0  ;;  %p55_p2 = scmp.ne.s32.totalorder %s695_s13, %s691_s12 }
   0xb   : > { %p779_p3 = scmp.eq.s32.totalorder %s433_s18, 0  ;;  %p123_p4 = scmp.eq.s32.totalorder %s433_s18, 1 }
   0xc   : > { %p51_p5 = por %p50_p1, %p49_p0  ;;  %p129_p6 = scmp.eq.s32.totalorder %s434_s19, 1 }
   0xd   : > { %s978_s21 = scalar_select %p779_p3, 1, 0 }
   0xe   : > { %p785_p7 = por %p779_p3, %p55_p2  ;;  %p789_p8 = por %p123_p4, %p49_p0 }
   0xf   : > { %p793_p9 = por %p129_p6, %p55_p2  ;;  %p435_p10 = scmp.ge.s32.totalorder %s711_s17, 1 }
  0x10   : > { %s979_s22 = scalar_select %p785_p7, 1, 0 }
  0x11   : > { %s980_s23 = scalar_select %p789_p8, 1, 0 }
  0x12   : > { %s981_s24 = scalar_select %p793_p9, 1, 0 }
  0x13   : > { %p136_p11 = scmp.lt.s32.totalorder %s711_s17, 3  ;;  %p499_p1 = scmp.lt.s32.totalorder %s711_s17, 2 }
  0x14   : > { %s158_s28 = sshll.u32 %s972_s2, 4  ;;  %s169_s4 = sand.u32 1, %s699_s14   ;;  %s159_s28 = int_to_ptr.vmem [resolvable:$true] %s158_s28 }
  0x15   : > { %p800_p13 = pnand %p435_p10, %p136_p11  ;;  %p810_p4 = pnand %p499_p1, %p51_p5 }
  0x16   : > { %s33_s5 = sadd.s32 1, %s707_s16  ;;  %s563_s8 = scalar_lea.hbm %s971_s1, 64 }
  0x17   : > { %p482_p0 = pneg %p800_p13  ;;  %p564_p5 = scmp.ne.s32.totalorder %s971_s1, %s563_s8 }
  0x18   : > { %p570_p1 = scmp.lt.u32.totalorder %s563_s8, %s971_s1 }
  0x19   : > { %p816_p2 = pnand %p482_p0, %p779_p3 }
  0x1b   : > { %p565_p6 = pneg %p816_p2 }
  0x1d   : > { %p566_p10 = pnand %p565_p6, %p564_p5 }
  0x1f   : > { %p567_p11 = pneg %p566_p10 }
  0x21   : > { %p572_p0 = pnand %p570_p1, %p567_p11 }
  0x23   : > { %575 = shalt.err (!%p572_p0)
}
  0x24   : > { %s713_s19 = smov [#allocation7]   ;;  %s576_s6 = scalar_lea.vmem %s159_s28, 16 }
  0x25   : > { %485 = dma.hbm_to_smem (!%p816_p2), %s971_s1, 64, %s713_s19, [#allocation5]  }
  0x26   : > { %p577_p12 = scmp.ne.s32.totalorder %s159_s28, %s576_s6  ;;  %p584_p3 = scmp.lt.s32.totalorder %s159_s28, %s159_s28 }
  0x27   : > { %p585_p5 = scmp.lt.s32.totalorder %s576_s6, %s576_s6 }
  0x28   : > { %p579_p9 = pnand %p577_p12, %p565_p6 }
  0x29   : > { %p586_p10 = por %p585_p5, %p584_p3 }
  0x2a   : > { %p580_p8 = pneg %p579_p9 }
  0x2c   : > { %p587_p7 = pnand %p586_p10, %p580_p8 }
  0x2e   : > { %590 = shalt.err (!%p587_p7)
}
  0x2f   : > { %s714_s7 = smov [#allocation8]   ;;  %p35_p11 = scmp.ge.s32.totalorder %s33_s5, 2 }
  0x30   : > { %488 = dma.vmem_to_smem (!%p816_p2), %s159_s28, 16, %s714_s7, [#allocation6]  }
  0x31   : > { %s439_s8 = sshll.u32 %s169_s4, 3  ;;  %s467_s9 = sshll.u32 %s707_s16, 7 }
  0x32   : > { %s996_s5 = smov (%p35_p11, %s33_s5), 0  ;;  %s848_s30 = scalar_lea.hbm %s970_s0, %s467_s9 }
  0x33   : > { %s37_s18 = ssub.s32 %s707_s16, %s996_s5  ;;  %s173_s19 = scalar_lea.vmem [#allocation2], %s439_s8 }
  0x34   : > { %s181_s28 = sshll.u32 %s173_s19, 4  ;;  %p40_p3 = scmp.eq.s32.totalorder %s37_s18, 0  ;;  %s852_s28 = int_to_ptr.vmem [resolvable:$true] %s181_s28 }
  0x35   : > { %s861_s27 = scalar_lea.sflag [#allocation3], %s169_s4  ;;  %s591_s6 = scalar_lea.hbm %s848_s30, 128 }
  0x36   : > { %s857_s26 = scalar_select %p40_p3, %s699_s14, %s42_s20  }
  0x37   : > { %p592_p7 = scmp.ne.s32.totalorder %s848_s30, %s591_s6  ;;  %p593_p8 = pneg %p810_p4 }
  0x38   : > { %s596_s9 = scalar_lea.hbm %s970_s0, 256  ;;  %p597_p2 = scmp.lt.u32.totalorder %s848_s30, %s970_s0 }
  0x39   : > { %p594_p9 = pnand %p593_p8, %p592_p7  ;;  %p598_p6 = scmp.lt.u32.totalorder %s596_s9, %s591_s6 }
  0x3a   : > { %p600_p0 = scmp.lt.u32.totalorder %s591_s6, %s848_s30 }
  0x3b   : > { %p595_p12 = pneg %p594_p9  ;;  %p599_p1 = por %p598_p6, %p597_p2 }
  0x3d   : > { %p601_p5 = por %p600_p0, %p599_p1 }
  0x3f   : > { %p602_p10 = pnand %p601_p5, %p595_p12 }
  0x41   : > { %605 = shalt.err (!%p602_p10)
}
  0x42   : > { %s606_s20 = scalar_lea.vmem %s852_s28, 128  ;;  %s715_s4 = smov [#allocation2]  }
  0x43   : > { %p607_p11 = scmp.ne.s32.totalorder %s852_s28, %s606_s20  ;;  %s611_s18 = sshll.u32 %s715_s4, 4  ;;  %s612_s18 = int_to_ptr.vmem [resolvable:$false] %s611_s18 }
  0x44   : > { %s613_s19 = scalar_lea.vmem %s612_s18, 256  ;;  %p614_p9 = scmp.lt.s32.totalorder %s852_s28, %s612_s18 }
  0x45   : > { %p609_p3 = pnand %p607_p11, %p593_p8  ;;  %p615_p2 = scmp.lt.s32.totalorder %s613_s19, %s606_s20 }
  0x47   : > { %p610_p7 = pneg %p609_p3  ;;  %p616_p6 = por %p615_p2, %p614_p9 }
  0x49   : > { %p617_p1 = pnand %p616_p6, %p610_p7 }
  0x4b   : > { %620 = shalt.err (!%p617_p1)
}
  0x4c   : > { %s716_s6 = smov 32   ;;  %s717_s7 = smov 2  }
  0x4d   : > { %492 = dma.hbm_to_vmem [thread:$0]  (!%p810_p4), %s848_s30, 128, %s852_s28, %s861_s27, %s716_s6, %s716_s6, %s717_s7  }
  0x4e   : > { %193 = sbr.rel (%p800_p13) target bundleno = 147 (0x93), region = 32  ;;  %s892_s8 = sand.u32 (!%p800_p13), 1, %s695_s13  }
  0x4f   : > { %s443_s9 = sshll.u32 (!%p800_p13), %s892_s8, 3  ;;  %s196_s10 = scalar_lea.sflag (!%p800_p13), [#allocation3], %s892_s8 }
  0x50   : > { %s199_s11 = scalar_lea.vmem (!%p800_p13), [#allocation2], %s443_s9  ;;  %p985_p8 = scmp.ne.s32.totalorder (!%p800_p13), %s979_s22, 0 }
  0x55   : > { %674 = dma.done.wait (%p985_p8), %s196_s10, 128  }
  0x56   : > { %676 = vsyncadd (%p985_p8), %s196_s10, 4294967168  ;;  %p986_p12 = scmp.ne.s32.totalorder %s978_s21, 0 }
  0x58   : > { %678 = dma.done.wait (%p986_p12), [#allocation5], 64  }
  0x59   : > { %680 = vsyncadd (%p986_p12), [#allocation5], 4294967232 }
  0x5a   : > { %682 = dma.done.wait (%p986_p12), [#allocation6], 16  }
  0x5b   : > { %684 = vsyncadd (%p986_p12), [#allocation6], 4294967280 }
  0x5c   : > { %212 = sfence }
  0x5d   : > { %s238_s25 = sld [smem:[#allocation7]]  ;;  %s449_s29 = sld [smem:[#allocation7 + $0x1]]  ;;  %v231_v0 = vld [vmem:[%s199_s11] sm:$0x3]  ;;  %v446_v1 = vld [vmem:[%s199_s11 + $0x2] sm:$0x3] }
  0x5e   : > { %s450_s30 = sld [smem:[#allocation7 + $0x2]]  ;;  %s451_s28 = sld [smem:[#allocation7 + $0x3]]  ;;  %v447_v2 = vld [vmem:[%s199_s11 + $0x4] sm:$0x3]  ;;  %v448_v4 = vld [vmem:[%s199_s11 + $0x6] sm:$0x3] }
  0x5f   : > { %s908_s22 = sld [smem:[#allocation8]]  ;;  %s453_s20 = sld [smem:[#allocation7 + $0x81]] }
  0x60   : > { %s452_s27 = sld [smem:[#allocation7 + $0x80]]  ;;  %s454_s4 = sld [smem:[#allocation7 + $0x82]] }
  0x61   : > { %s455_s18 = sld [smem:[#allocation7 + $0x83]]  ;;  %s458_s21 = sld [smem:[#allocation7 + $0x100]] }
  0x62   : > { %s459_s19 = sld [smem:[#allocation7 + $0x101]]  ;;  %s460_s6 = sld [smem:[#allocation7 + $0x102]] }
  0x63   : > { %v239_v3 = vstv %s238_s25  ;;  %v242_v6 = vstv %s449_s29  ;;  %s461_s7 = sld [smem:[#allocation7 + $0x103]]  ;;  %s910_s9 = sld [smem:[#allocation8 + $0x1]] }
  0x64   : > { %v240_v5 = vmul.f32 %v239_v3, %v231_v0  ;;  %v243_v7 = vmul.f32 %v446_v1, %v242_v6  ;;  %v246_v8 = vstv %s450_s30  ;;  %v250_v9 = vstv %s451_s28  ;;  %s462_s10 = sld [smem:[#allocation8 + $0x2]]  ;;  %s468_s11 = smul.u32 6, %s892_s8 }
  0x65   : > { %v247_v10 = vmul.f32 %v447_v2, %v246_v8  ;;  %v251_v12 = vmul.f32 %v448_v4, %v250_v9  ;;  %v265_v15 = vstv %s453_s20  ;;  %v254_v21 = vstv %s908_s22  ;;  %s469_s30 = smul.u32 96, %s703_s15  ;;  %s310_s20 = scalar_lea.sflag [#allocation4], %s892_s8 }
  0x66   : > { %v244_v11 = vadd.f32 %v243_v7, %v240_v5  ;;  %v262_v13 = vstv %s452_s27  ;;  %v269_v16 = vstv %s454_s4  ;;  %v266_v18 = vmul.f32 %v446_v1, %v265_v15  ;;  %s230_s25 = scalar_lea.vmem [#allocation9], %s468_s11  ;;  %p987_p4 = scmp.ne.s32.totalorder %s980_s23, 0 }
  0x67   : > { %v263_v14 = vmul.f32 %v262_v13, %v231_v0  ;;  %v270_v19 = vmul.f32 %v447_v2, %v269_v16  ;;  %v273_v20 = vstv %s455_s18  ;;  %v286_v23 = vstv %s458_s21  ;;  %s324_s29 = sshll.u32 %s230_s25, 4  ;;  %s921_s27 = scalar_lea.hbm %s973_s3, %s469_s30  ;;  %s916_s29 = int_to_ptr.vmem [resolvable:$true] %s324_s29 }
  0x68   : > { %v248_v17 = vadd.f32 %v247_v10, %v244_v11  ;;  %v274_v22 = vmul.f32 %v448_v4, %v273_v20  ;;  %v289_v24 = vstv %s459_s19  ;;  %v287_v27 = vmul.f32 %v286_v23, %v231_v0  ;;  %s621_s4 = scalar_lea.vmem %s916_s29, 96  ;;  %s718_s15 = smov [#allocation9]  }
  0x69   : > { %v267_v26 = vadd.f32 %v266_v18, %v263_v14  ;;  %v290_v28 = vmul.f32 %v446_v1, %v289_v24  ;;  %v293_v29 = vstv %s460_s6  ;;  %v297_v30 = vstv %s461_s7  ;;  %p622_p13 = scmp.ne.s32.totalorder %s916_s29, %s621_s4  ;;  %s625_s18 = sshll.u32 %s718_s15, 4  ;;  %s626_s18 = int_to_ptr.vmem [resolvable:$false] %s625_s18 }
  0x6a   : > { %v252_v25 = vadd.f32 %v251_v12, %v248_v17  ;;  %v294_v34 = vmul.f32 %v447_v2, %v293_v29  ;;  %v277_v35 = vstv %s910_s9  ;;  %v298_v36 = vmul.f32 %v448_v4, %v297_v30  ;;  %s627_s21 = scalar_lea.vmem %s626_s18, 192  ;;  %p628_p10 = scmp.lt.s32.totalorder %s916_s29, %s626_s18 }
  0x6b   : > { %v271_v32 = vadd.f32 %v270_v19, %v267_v26  ;;  %v291_v33 = vadd.f32 %v290_v28, %v287_v27  ;;  %v301_v40 = vstv %s462_s10  ;;  %p623_p0 = pnand %p622_p13, %p987_p4  ;;  %p629_p11 = scmp.lt.s32.totalorder %s627_s21, %s621_s4 }
  0x6c   : > { %v255_v31 = vadd.f32 %v254_v21, %v252_v25 }
  0x6d   : > { %v275_v38 = vadd.f32 %v274_v22, %v271_v32  ;;  %v295_v39 = vadd.f32 %v294_v34, %v291_v33  ;;  %p624_p5 = pneg %p623_p0  ;;  %p630_p3 = por %p629_p11, %p628_p10 }
  0x6e   : > { %v256_v37 = vmul.f32 0.5, %v255_v31 }
  0x6f   : > { %v278_v41 = vadd.f32 %v277_v35, %v275_v38  ;;  %v299_v42 = vadd.f32 %v298_v36, %v295_v39  ;;  %p631_p7 = pnand %p630_p3, %p624_p5 }
  0x70   : > { %557 = vtanh.f32 %v256_v37 }
  0x71   : > { %v279_v43 = vmul.f32 0.5, %v278_v41  ;;  %v302_v44 = vadd.f32 %v301_v40, %v299_v42 }
  0x73   : > { %559 = vtanh.f32 %v279_v43  ;;  %v303_v45 = vmul.f32 0.5, %v302_v44 }
  0x75   : > { %561 = vtanh.f32 %v303_v45 }
  0x7a   : > { %v558_v46 = vpop.eup %557 }
  0x7b   : > { %v258_v47 = vadd.f32 1.0, %v558_v46 }
  0x7d   : > { %v259_v48 = vmul.f32 0.5, %v258_v47  ;;  %v560_v49 = vpop.eup %559 }
  0x7e   : > { %v281_v50 = vadd.f32 1.0, %v560_v49 }
  0x7f   : > { %260 = vst [vmem:[%s230_s25] sm:$0x3] %v259_v48  ;;  %v562_v51 = vpop.eup %561 }
  0x80   : > { %v282_v52 = vmul.f32 0.5, %v281_v50  ;;  %v305_v53 = vadd.f32 1.0, %v562_v51 }
  0x82   : > { %457 = vst [vmem:[%s230_s25 + $0x2] sm:$0x3] %v282_v52  ;;  %v306_v54 = vmul.f32 0.5, %v305_v53 }
  0x84   : > { %463 = vst [vmem:[%s230_s25 + $0x4] sm:$0x3] %v306_v54 }
  0x85   : > { %634 = shalt.err (!%p631_p7)
}
  0x86   : > { %s635_s19 = scalar_lea.hbm %s921_s27, 96  ;;  %s639_s9 = scalar_lea.hbm %s973_s3, 192 }
  0x87   : > { %p636_p9 = scmp.ne.s32.totalorder %s921_s27, %s635_s19  ;;  %p640_p1 = scmp.lt.u32.totalorder %s921_s27, %s973_s3 }
  0x88   : > { %p641_p8 = scmp.lt.u32.totalorder %s639_s9, %s635_s19  ;;  %p643_p13 = scmp.lt.u32.totalorder %s635_s19, %s921_s27 }
  0x89   : > { %p637_p2 = pnand %p636_p9, %p987_p4 }
  0x8a   : > { %p642_p12 = por %p641_p8, %p640_p1 }
  0x8b   : > { %p638_p6 = pneg %p637_p2 }
  0x8c   : > { %p644_p0 = por %p643_p13, %p642_p12 }
  0x8e   : > { %p645_p5 = pnand %p644_p0, %p638_p6 }
  0x90   : > { %648 = shalt.err (!%p645_p5)
}
  0x91   : > { %s719_s25 = smov 32   ;;  %s720_s30 = smov 2  }
  0x92   : > { %480 = dma.vmem_to_hbm [thread:$0]  (%p987_p4), %s916_s29, 96, %s921_s27, %s310_s20, %s719_s25, %s719_s25, %s720_s30  }
  0x93 PF: > { %s339_s28 = sand.u32 1, %s691_s12   ;;  %p988_p10 = scmp.ne.s32.totalorder %s981_s24, 0 }
  0x94   : > { %p989_p11 = scmp.ge.s32.totalorder %s711_s17, 2  ;;  %s340_s22 = scalar_lea.sflag [#allocation4], %s339_s28 }
  0x96   : > { %p494_p3 = pnand %p989_p11, %p988_p10 }
  0x98   : > { %686 = dma.done.wait (!%p494_p3), %s340_s22, 96  }
  0x99   : > { %688 = vsyncadd (!%p494_p3), %s340_s22, 4294967200  ;;  %s21_s17 = sadd.s32 1, %s711_s17   ;;  %s990_s12 = smov %s695_s13 }
  0x9a   : > { %p18_p7 = scmp.ge.s32.totalorder %s21_s17, 4   ;;  %s991_s13 = smov %s699_s14 }
  0x9b   : > { %s992_s14 = smov %s857_s26  ;;  %s993_s15 = smov %s707_s16 }
  0x9c   : > { %s994_s16 = smov %s996_s5  ;;  %20 = sbr.rel (!%p18_p7) target bundleno = 8 (0x8), region = 92 }
  0xa3   :  { %345 = vsyncpa [#allocation3], 1 }
  0xa4   :  { %347 = vsyncpa [#allocation3 + $0x1], 1 }
  0xa5   :  { %348 = vsyncpa [#allocation4], 1 }
  0xa6   :  { %350 = vsyncpa [#allocation4 + $0x1], 1 }
  0xa7   :  { %351 = vsyncpa [#allocation5], 1 }
  0xa8   :  { %353 = vsyncpa [#allocation5 + $0x1], 1 }
  0xa9   :  { %354 = vsyncpa [#allocation6], 1 }
  0xaa   :  { %356 = vsyncpa [#allocation6 + $0x1], 1 }

</bundles_post_ra>
